<compile_context>
chip_gen: v7x
topology: tpu7x:2x2x1
jax: 0.10.0
libtpu: 0.0.40
codegen_flags: <defaults>
</compile_context>

<pallas_src>
import functools

import jax
import jax.numpy as jnp
import numpy as np
from jax.experimental import pallas as pl
from jax.experimental.pallas import tpu as pltpu

_LANES = 128
# 26ch * 512 rows * 128 lanes * 4 B = 6.8 MiB per f32 input block;
# x2 inputs x2 pipeline buffers ~= 27 MiB -> fits the 48 MiB scoped limit below
# on every generation (v7x physical VMEM is 64 MiB per TensorCore).
_TARGET_ROWS_32BIT = 512
_TARGET_ROWS_16BIT = 1024
_VMEM_LIMIT_BYTES = 48 * 1024 * 1024


def _make_kernel(max_degree, s_tile, steps_per_chunk, s_valid_rows, need_mask):
    """Builds the per-(batch, chunk, spatial-step) kernel body."""

    def kernel(o_ref, t_ref, kp_ref, dp_ref, dv_ref):
        s = pl.program_id(2)  # spatial reduction axis ("arbitrary")

        # Output blocks are resident across the reduction axis -> use them as
        # the accumulators directly (no VMEM scratch, no finalize step).
        @pl.when(s == 0)
        def _():
            kp_ref[...] = jnp.zeros_like(kp_ref)
            dp_ref[...] = jnp.zeros_like(dp_ref)
            dv_ref[...] = jnp.zeros_like(dv_ref)

        def oc(c):  # one output channel slab, cast in-kernel (no wrapper upcast)
            return o_ref[0, c].astype(jnp.float32)  # (s_tile, 128)

        def tc(c):
            return t_ref[0, c].astype(jnp.float32)  # (s_tile, 128)

        t0 = tc(0)
        soft_mask = jnp.clip(t0 - 0.01, 0.0, 0.99) + 0.01

        def ce2(l0, l1, p0, p1):
            # 2-class soft-target cross entropy per pixel; stable logsumexp with
            # a single exp + single log1p (EUP-friendly).
            lse = jnp.maximum(l0, l1) + jnp.log1p(jnp.exp(-jnp.abs(l0 - l1)))
            return (p0 + p1) * lse - (p0 * l0 + p1 * l1)

        # keypoint probability loss map
        kp_map = ce2(oc(0), oc(1), t0, tc(1))

        # accumulate the CE maps and squared-diff maps, mask once at the end
        ce_sum = jnp.zeros_like(soft_mask)
        dd_sum = jnp.zeros_like(soft_mask)
        for i in range(max_degree):
            base = 2 + 4 * i
            ce_sum = ce_sum + ce2(oc(base), oc(base + 1), tc(base), tc(base + 1))
            d0 = oc(base + 2) - tc(base + 2)
            d1 = oc(base + 3) - tc(base + 3)
            dd_sum = dd_sum + d0 * d0 + d1 * d1
        dp_map = soft_mask * ce_sum
        dv_map = soft_mask * dd_sum

        if need_mask:
            # Last spatial block is ragged: zero the contribution of rows that
            # lie beyond S.  jnp.where (select) is NaN/garbage-safe for the
            # unspecified contents of the partial block.
            blk = pl.program_id(1) * steps_per_chunk + s
            row = (jax.lax.broadcasted_iota(jnp.int32, (s_tile, _LANES), 0)
                   + blk * s_tile)
            valid = row < s_valid_rows
            kp_map = jnp.where(valid, kp_map, 0.0)
            dp_map = jnp.where(valid, dp_map, 0.0)
            dv_map = jnp.where(valid, dv_map, 0.0)

        # Sublane-reduce each map to a 128-lane partial and accumulate into the
        # resident output block.  Lane + batch/chunk sums happen in the wrapper.
        kp_ref[...] += jnp.sum(kp_map, axis=0).reshape(1, 1, _LANES)
        dp_ref[...] += jnp.sum(dp_map, axis=0).reshape(1, 1, _LANES)
        dv_ref[...] += jnp.sum(dv_map, axis=0).reshape(1, 1, _LANES)

    return kernel


@functools.partial(jax.jit, static_argnames=("max_degree", "s_tile"))
def supervised_loss(imagegraph_outputs, imagegraph_targets, max_degree=6,
                    s_tile=None):
    """imagegraph_outputs / imagegraph_targets: [B, C, H, W], C = 2 + 4*max_degree."""
    B, C, H, W = imagegraph_outputs.shape
    assert C == 2 + 4 * max_degree
    HW = H * W
    itemsize = jnp.dtype(imagegraph_outputs.dtype).itemsize

    o = imagegraph_outputs.reshape(B, C, HW)
    t = imagegraph_targets.reshape(B, C, HW)

    rem = HW % _LANES
    if rem:
        # TODO(synk): this fallback still copies both arrays in HBM; a manual
        # tail DMA would avoid it, but HW % 128 != 0 is rare for real feature
        # maps and the common path below is copy-free.
        pad = _LANES - rem
        o = jnp.pad(o, ((0, 0), (0, 0), (0, pad)))
        t = jnp.pad(t, ((0, 0), (0, 0), (0, pad)))
    S = o.shape[-1] // _LANES
    # Free (bitcast) reshape to the lane/sublane-dense layout [B, C, S, 128].
    o = o.reshape(B, C, S, _LANES)
    t = t.reshape(B, C, S, _LANES)

    if s_tile is None:
        target = _TARGET_ROWS_16BIT if itemsize <= 2 else _TARGET_ROWS_32BIT
        s_tile = S if S <= target else target
    assert s_tile == S or s_tile % 8 == 0, "s_tile must be a multiple of 8"

    steps_total = -(-S // s_tile)                   # ceil-div, ragged tail masked
    need_mask = (steps_total * s_tile != S)

    # v7x megacore: if there is only one batch element, split the spatial steps
    # into two parallel chunks so both TensorCores get work.  Chunks map to
    # distinct partial-output rows, so there is no accumulator race.
    n_chunks = 2 if (B == 1 and steps_total >= 2 and steps_total % 2 == 0) else 1
    steps_per_chunk = steps_total // n_chunks

    kernel = _make_kernel(max_degree, s_tile, steps_per_chunk, S, need_mask)
    part_shape = jax.ShapeDtypeStruct((B * n_chunks, 1, _LANES), jnp.float32)

    in_spec = pl.BlockSpec(
        (1, C, s_tile, _LANES),
        lambda b, p, s: (b, 0, p * steps_per_chunk + s, 0))
    out_spec = pl.BlockSpec(
        (1, 1, _LANES),
        lambda b, p, s: (b * n_chunks + p, 0, 0))

    kp_p, dp_p, dv_p = pl.pallas_call(
        kernel,
        out_shape=(part_shape, part_shape, part_shape),
        grid_spec=pltpu.PrefetchScalarGridSpec(
            num_scalar_prefetch=0,
            grid=(B, n_chunks, steps_per_chunk),
            in_specs=[in_spec, in_spec],
            out_specs=[out_spec, out_spec, out_spec],
        ),
        compiler_params=pltpu.CompilerParams(
            dimension_semantics=("parallel", "parallel", "arbitrary"),
            vmem_limit_bytes=_VMEM_LIMIT_BYTES),
    )(o, t)

    denom = float(B * HW)  # true (unpadded) pixel count
    kp = jnp.sum(kp_p) / denom
    dp = jnp.sum(dp_p) * (10.0 / (max_degree * denom))
    dv = jnp.sum(dv_p) * (1000.0 / (max_degree * 2 * denom))
    return kp, dp, dv


def _reference_loss(o, t, max_degree=6):
    """Pure-JAX reference replicating the PyTorch module."""
    o = o.astype(jnp.float32)
    t = t.astype(jnp.float32)
    soft_mask = jnp.clip(t[:, 0] - 0.01, 0.0, 0.99) + 0.01  # (B, H, W)

    def ce(logits, targ):  # channel axis = 1
        lsm = jax.nn.log_softmax(logits, axis=1)
        return -jnp.sum(targ * lsm, axis=1)  # (B, H, W)

    kp = jnp.mean(ce(o[:, 0:2], t[:, 0:2]))
    dp = 0.0
    dv = 0.0
    for i in range(max_degree):
        base = 2 + i * 4
        dp += jnp.mean(soft_mask * ce(o[:, base:base + 2], t[:, base:base + 2]))
        d = o[:, base + 2:base + 4] - t[:, base + 2:base + 4]
        dv += jnp.mean(soft_mask[:, None] * (d * d))
    dp /= max_degree
    dv /= max_degree
    return kp, dp * 10.0, dv * 1000.0


def _check(name, got, ref, atol):
    for g, r, a in zip(got, ref, atol):
        np.testing.assert_allclose(np.array(g), np.array(r), rtol=1e-3, atol=a,
                                   err_msg=name)


if __name__ == "__main__":
    MAX_DEGREE = 6
    C = 2 + 4 * MAX_DEGREE  # 26

    key = jax.random.PRNGKey(0)
    k_out, k_tgt = jax.random.split(key)

    # Case 1: small aligned shape, single spatial block, B=2.
    B, H, W = 2, 16, 16
    o1 = jax.random.normal(k_out, (B, C, H, W), dtype=jnp.float32)
    t1 = jax.random.uniform(k_tgt, (B, C, H, W), dtype=jnp.float32)
    res1 = supervised_loss(o1, t1, max_degree=MAX_DEGREE)
    jax.block_until_ready(res1)
    _check("case1", res1, _reference_loss(o1, t1, MAX_DEGREE),
           atol=(1e-3, 1e-3, 1e-2))

    # Case 2: forced small tile that does NOT divide S -> exercises the
    # in-kernel ragged-tail masking (S = 12 rows, tile = 8).
    B2, H2, W2 = 2, 12, 128
    o2 = jax.random.normal(k_out, (B2, C, H2, W2), dtype=jnp.float32)
    t2 = jax.random.uniform(k_tgt, (B2, C, H2, W2), dtype=jnp.float32)
    res2 = supervised_loss(o2, t2, max_degree=MAX_DEGREE, s_tile=8)
    jax.block_until_ready(res2)
    _check("case2", res2, _reference_loss(o2, t2, MAX_DEGREE),
           atol=(1e-3, 1e-3, 1e-2))

    # Case 3: B=1 with bf16 inputs and two spatial steps -> exercises the
    # megacore chunk split and native bf16 streaming (S = 32, tile = 16).
    B3, H3, W3 = 1, 32, 128
    o3 = jax.random.normal(k_out, (B3, C, H3, W3), dtype=jnp.bfloat16)
    t3 = jax.random.uniform(k_tgt, (B3, C, H3, W3), dtype=jnp.bfloat16)
    res3 = supervised_loss(o3, t3, max_degree=MAX_DEGREE, s_tile=16)
    jax.block_until_ready(res3)
    _check("case3", res3, _reference_loss(o3, t3, MAX_DEGREE),
           atol=(1e-3, 1e-3, 1e-2))

    print("KERNEL_OK")
</pallas_src>

<mosaic_0001>
module attributes {stable_mosaic.version = 11 : i64} {
  func.func @kernel(%arg0: i32, %arg1: i32, %arg2: i32, %arg3: memref<1x26x2x128xf32, #tpu.memory_space<vmem>>, %arg4: memref<1x26x2x128xf32, #tpu.memory_space<vmem>>, %arg5: memref<1x1x128xf32, #tpu.memory_space<vmem>>, %arg6: memref<1x1x128xf32, #tpu.memory_space<vmem>>, %arg7: memref<1x1x128xf32, #tpu.memory_space<vmem>>) attributes {dimension_semantics = [#tpu.dimension_semantics<parallel>, #tpu.dimension_semantics<parallel>, #tpu.dimension_semantics<arbitrary>], iteration_bounds = array<i64: 2, 1, 1>, scalar_prefetch = 0 : i64, scratch_operands = 0 : i64, tpu.core_type = #tpu.core_type<tc>, window_params = [{transform_indices = @transform_0, window_bounds = array<i64: 1, 26, 2, 128>}, {transform_indices = @transform_1, window_bounds = array<i64: 1, 26, 2, 128>}, {transform_indices = @transform_2, window_bounds = array<i64: 1, 1, 128>}, {transform_indices = @transform_3, window_bounds = array<i64: 1, 1, 128>}, {transform_indices = @transform_4, window_bounds = array<i64: 1, 1, 128>}]} {
    %c0_i32 = arith.constant 0 : i32
    %0 = arith.cmpi eq, %arg2, %c0_i32 : i32
    %1 = arith.extui %0 : i1 to i32
    %c0_i32_0 = arith.constant 0 : i32
    %2 = arith.cmpi ne, %1, %c0_i32_0 : i32
    scf.if %2 {
      %cst_216 = arith.constant 0.000000e+00 : f32
      %274 = vector.broadcast %cst_216 : f32 to vector<1x1x128xf32>
      %c0_217 = arith.constant 0 : index
      %c0_218 = arith.constant 0 : index
      %c0_219 = arith.constant 0 : index
      %275 = vector.load %arg5[%c0_217, %c0_218, %c0_219] : memref<1x1x128xf32, #tpu.memory_space<vmem>>, vector<1x1x128xf32>
      tpu.vector_store %arg5[%c0_217, %c0_218, %c0_219], %274 {strides = array<i32>} : memref<1x1x128xf32, #tpu.memory_space<vmem>>, vector<1x1x128xf32>,
      %cst_220 = arith.constant 0.000000e+00 : f32
      %276 = vector.broadcast %cst_220 : f32 to vector<1x1x128xf32>
      %c0_221 = arith.constant 0 : index
      %c0_222 = arith.constant 0 : index
      %c0_223 = arith.constant 0 : index
      %277 = vector.load %arg6[%c0_221, %c0_222, %c0_223] : memref<1x1x128xf32, #tpu.memory_space<vmem>>, vector<1x1x128xf32>
      tpu.vector_store %arg6[%c0_221, %c0_222, %c0_223], %276 {strides = array<i32>} : memref<1x1x128xf32, #tpu.memory_space<vmem>>, vector<1x1x128xf32>,
      %cst_224 = arith.constant 0.000000e+00 : f32
      %278 = vector.broadcast %cst_224 : f32 to vector<1x1x128xf32>
      %c0_225 = arith.constant 0 : index
      %c0_226 = arith.constant 0 : index
      %c0_227 = arith.constant 0 : index
      %279 = vector.load %arg7[%c0_225, %c0_226, %c0_227] : memref<1x1x128xf32, #tpu.memory_space<vmem>>, vector<1x1x128xf32>
      tpu.vector_store %arg7[%c0_225, %c0_226, %c0_227], %278 {strides = array<i32>} : memref<1x1x128xf32, #tpu.memory_space<vmem>>, vector<1x1x128xf32>,
    } else {
    }
    %c0 = arith.constant 0 : index
    %c0_1 = arith.constant 0 : index
    %c0_2 = arith.constant 0 : index
    %c0_3 = arith.constant 0 : index
    %3 = vector.load %arg4[%c0, %c0_1, %c0_2, %c0_3] : memref<1x26x2x128xf32, #tpu.memory_space<vmem>>, vector<1x1x2x128xf32>
    %4 = vector.shape_cast %3 : vector<1x1x2x128xf32> to vector<2x128xf32>
    %cst = arith.constant 0.00999999977 : f32
    %5 = vector.broadcast %cst : f32 to vector<2x128xf32>
    %6 = arith.subf %4, %5 : vector<2x128xf32>
    %cst_4 = arith.constant 0.000000e+00 : f32
    %cst_5 = arith.constant 9.900000e-01 : f32
    %7 = vector.broadcast %cst_4 : f32 to vector<2x128xf32>
    %8 = arith.maximumf %7, %6 : vector<2x128xf32>
    %9 = vector.broadcast %cst_5 : f32 to vector<2x128xf32>
    %10 = arith.minimumf %9, %8 : vector<2x128xf32>
    %cst_6 = arith.constant 0.00999999977 : f32
    %11 = vector.broadcast %cst_6 : f32 to vector<2x128xf32>
    %12 = arith.addf %10, %11 : vector<2x128xf32>
    %c0_7 = arith.constant 0 : index
    %c0_8 = arith.constant 0 : index
    %c0_9 = arith.constant 0 : index
    %c0_10 = arith.constant 0 : index
    %13 = vector.load %arg3[%c0_7, %c0_8, %c0_9, %c0_10] : memref<1x26x2x128xf32, #tpu.memory_space<vmem>>, vector<1x1x2x128xf32>
    %14 = vector.shape_cast %13 : vector<1x1x2x128xf32> to vector<2x128xf32>
    %c0_11 = arith.constant 0 : index
    %c1 = arith.constant 1 : index
    %c0_12 = arith.constant 0 : index
    %c0_13 = arith.constant 0 : index
    %15 = vector.load %arg3[%c0_11, %c1, %c0_12, %c0_13] : memref<1x26x2x128xf32, #tpu.memory_space<vmem>>, vector<1x1x2x128xf32>
    %16 = vector.shape_cast %15 : vector<1x1x2x128xf32> to vector<2x128xf32>
    %c0_14 = arith.constant 0 : index
    %c1_15 = arith.constant 1 : index
    %c0_16 = arith.constant 0 : index
    %c0_17 = arith.constant 0 : index
    %17 = vector.load %arg4[%c0_14, %c1_15, %c0_16, %c0_17] : memref<1x26x2x128xf32, #tpu.memory_space<vmem>>, vector<1x1x2x128xf32>
    %18 = vector.shape_cast %17 : vector<1x1x2x128xf32> to vector<2x128xf32>
    %19 = arith.maximumf %14, %16 : vector<2x128xf32>
    %20 = arith.subf %14, %16 : vector<2x128xf32>
    %21 = math.absf %20 : vector<2x128xf32>
    %cst_18 = arith.constant 0.000000e+00 : f32
    %22 = vector.broadcast %cst_18 : f32 to vector<2x128xf32>
    %23 = arith.subf %22, %21 : vector<2x128xf32>
    %24 = math.exp %23 : vector<2x128xf32>
    %25 = math.log1p %24 : vector<2x128xf32>
    %26 = arith.addf %19, %25 : vector<2x128xf32>
    %27 = arith.addf %4, %18 : vector<2x128xf32>
    %28 = arith.mulf %27, %26 : vector<2x128xf32>
    %29 = arith.mulf %4, %14 : vector<2x128xf32>
    %30 = arith.mulf %18, %16 : vector<2x128xf32>
    %31 = arith.addf %29, %30 : vector<2x128xf32>
    %32 = arith.subf %28, %31 : vector<2x128xf32>
    %cst_19 = arith.constant 0.000000e+00 : f32
    %33 = vector.broadcast %cst_19 : f32 to vector<2x128xf32>
    %cst_20 = arith.constant 0.000000e+00 : f32
    %34 = vector.broadcast %cst_20 : f32 to vector<2x128xf32>
    %c0_21 = arith.constant 0 : index
    %c2 = arith.constant 2 : index
    %c0_22 = arith.constant 0 : index
    %c0_23 = arith.constant 0 : index
    %35 = vector.load %arg3[%c0_21, %c2, %c0_22, %c0_23] : memref<1x26x2x128xf32, #tpu.memory_space<vmem>>, vector<1x1x2x128xf32>
    %36 = vector.shape_cast %35 : vector<1x1x2x128xf32> to vector<2x128xf32>
    %c0_24 = arith.constant 0 : index
    %c3 = arith.constant 3 : index
    %c0_25 = arith.constant 0 : index
    %c0_26 = arith.constant 0 : index
    %37 = vector.load %arg3[%c0_24, %c3, %c0_25, %c0_26] : memref<1x26x2x128xf32, #tpu.memory_space<vmem>>, vector<1x1x2x128xf32>
    %38 = vector.shape_cast %37 : vector<1x1x2x128xf32> to vector<2x128xf32>
    %c0_27 = arith.constant 0 : index
    %c2_28 = arith.constant 2 : index
    %c0_29 = arith.constant 0 : index
    %c0_30 = arith.constant 0 : index
    %39 = vector.load %arg4[%c0_27, %c2_28, %c0_29, %c0_30] : memref<1x26x2x128xf32, #tpu.memory_space<vmem>>, vector<1x1x2x128xf32>
    %40 = vector.shape_cast %39 : vector<1x1x2x128xf32> to vector<2x128xf32>
    %c0_31 = arith.constant 0 : index
    %c3_32 = arith.constant 3 : index
    %c0_33 = arith.constant 0 : index
    %c0_34 = arith.constant 0 : index
    %41 = vector.load %arg4[%c0_31, %c3_32, %c0_33, %c0_34] : memref<1x26x2x128xf32, #tpu.memory_space<vmem>>, vector<1x1x2x128xf32>
    %42 = vector.shape_cast %41 : vector<1x1x2x128xf32> to vector<2x128xf32>
    %43 = arith.maximumf %36, %38 : vector<2x128xf32>
    %44 = arith.subf %36, %38 : vector<2x128xf32>
    %45 = math.absf %44 : vector<2x128xf32>
    %cst_35 = arith.constant 0.000000e+00 : f32
    %46 = vector.broadcast %cst_35 : f32 to vector<2x128xf32>
    %47 = arith.subf %46, %45 : vector<2x128xf32>
    %48 = math.exp %47 : vector<2x128xf32>
    %49 = math.log1p %48 : vector<2x128xf32>
    %50 = arith.addf %43, %49 : vector<2x128xf32>
    %51 = arith.addf %40, %42 : vector<2x128xf32>
    %52 = arith.mulf %51, %50 : vector<2x128xf32>
    %53 = arith.mulf %40, %36 : vector<2x128xf32>
    %54 = arith.mulf %42, %38 : vector<2x128xf32>
    %55 = arith.addf %53, %54 : vector<2x128xf32>
    %56 = arith.subf %52, %55 : vector<2x128xf32>
    %57 = arith.addf %33, %56 : vector<2x128xf32>
    %c0_36 = arith.constant 0 : index
    %c4 = arith.constant 4 : index
    %c0_37 = arith.constant 0 : index
    %c0_38 = arith.constant 0 : index
    %58 = vector.load %arg3[%c0_36, %c4, %c0_37, %c0_38] : memref<1x26x2x128xf32, #tpu.memory_space<vmem>>, vector<1x1x2x128xf32>
    %59 = vector.shape_cast %58 : vector<1x1x2x128xf32> to vector<2x128xf32>
    %c0_39 = arith.constant 0 : index
    %c4_40 = arith.constant 4 : index
    %c0_41 = arith.constant 0 : index
    %c0_42 = arith.constant 0 : index
    %60 = vector.load %arg4[%c0_39, %c4_40, %c0_41, %c0_42] : memref<1x26x2x128xf32, #tpu.memory_space<vmem>>, vector<1x1x2x128xf32>
    %61 = vector.shape_cast %60 : vector<1x1x2x128xf32> to vector<2x128xf32>
    %62 = arith.subf %59, %61 : vector<2x128xf32>
    %c0_43 = arith.constant 0 : index
    %c5 = arith.constant 5 : index
    %c0_44 = arith.constant 0 : index
    %c0_45 = arith.constant 0 : index
    %63 = vector.load %arg3[%c0_43, %c5, %c0_44, %c0_45] : memref<1x26x2x128xf32, #tpu.memory_space<vmem>>, vector<1x1x2x128xf32>
    %64 = vector.shape_cast %63 : vector<1x1x2x128xf32> to vector<2x128xf32>
    %c0_46 = arith.constant 0 : index
    %c5_47 = arith.constant 5 : index
    %c0_48 = arith.constant 0 : index
    %c0_49 = arith.constant 0 : index
    %65 = vector.load %arg4[%c0_46, %c5_47, %c0_48, %c0_49] : memref<1x26x2x128xf32, #tpu.memory_space<vmem>>, vector<1x1x2x128xf32>
    %66 = vector.shape_cast %65 : vector<1x1x2x128xf32> to vector<2x128xf32>
    %67 = arith.subf %64, %66 : vector<2x128xf32>
    %68 = arith.mulf %62, %62 : vector<2x128xf32>
    %69 = arith.addf %34, %68 : vector<2x128xf32>
    %70 = arith.mulf %67, %67 : vector<2x128xf32>
    %71 = arith.addf %69, %70 : vector<2x128xf32>
    %c0_50 = arith.constant 0 : index
    %c6 = arith.constant 6 : index
    %c0_51 = arith.constant 0 : index
    %c0_52 = arith.constant 0 : index
    %72 = vector.load %arg3[%c0_50, %c6, %c0_51, %c0_52] : memref<1x26x2x128xf32, #tpu.memory_space<vmem>>, vector<1x1x2x128xf32>
    %73 = vector.shape_cast %72 : vector<1x1x2x128xf32> to vector<2x128xf32>
    %c0_53 = arith.constant 0 : index
    %c7 = arith.constant 7 : index
    %c0_54 = arith.constant 0 : index
    %c0_55 = arith.constant 0 : index
    %74 = vector.load %arg3[%c0_53, %c7, %c0_54, %c0_55] : memref<1x26x2x128xf32, #tpu.memory_space<vmem>>, vector<1x1x2x128xf32>
    %75 = vector.shape_cast %74 : vector<1x1x2x128xf32> to vector<2x128xf32>
    %c0_56 = arith.constant 0 : index
    %c6_57 = arith.constant 6 : index
    %c0_58 = arith.constant 0 : index
    %c0_59 = arith.constant 0 : index
    %76 = vector.load %arg4[%c0_56, %c6_57, %c0_58, %c0_59] : memref<1x26x2x128xf32, #tpu.memory_space<vmem>>, vector<1x1x2x128xf32>
    %77 = vector.shape_cast %76 : vector<1x1x2x128xf32> to vector<2x128xf32>
    %c0_60 = arith.constant 0 : index
    %c7_61 = arith.constant 7 : index
    %c0_62 = arith.constant 0 : index
    %c0_63 = arith.constant 0 : index
    %78 = vector.load %arg4[%c0_60, %c7_61, %c0_62, %c0_63] : memref<1x26x2x128xf32, #tpu.memory_space<vmem>>, vector<1x1x2x128xf32>
    %79 = vector.shape_cast %78 : vector<1x1x2x128xf32> to vector<2x128xf32>
    %80 = arith.maximumf %73, %75 : vector<2x128xf32>
    %81 = arith.subf %73, %75 : vector<2x128xf32>
    %82 = math.absf %81 : vector<2x128xf32>
    %cst_64 = arith.constant 0.000000e+00 : f32
    %83 = vector.broadcast %cst_64 : f32 to vector<2x128xf32>
    %84 = arith.subf %83, %82 : vector<2x128xf32>
    %85 = math.exp %84 : vector<2x128xf32>
    %86 = math.log1p %85 : vector<2x128xf32>
    %87 = arith.addf %80, %86 : vector<2x128xf32>
    %88 = arith.addf %77, %79 : vector<2x128xf32>
    %89 = arith.mulf %88, %87 : vector<2x128xf32>
    %90 = arith.mulf %77, %73 : vector<2x128xf32>
    %91 = arith.mulf %79, %75 : vector<2x128xf32>
    %92 = arith.addf %90, %91 : vector<2x128xf32>
    %93 = arith.subf %89, %92 : vector<2x128xf32>
    %94 = arith.addf %57, %93 : vector<2x128xf32>
    %c0_65 = arith.constant 0 : index
    %c8 = arith.constant 8 : index
    %c0_66 = arith.constant 0 : index
    %c0_67 = arith.constant 0 : index
    %95 = vector.load %arg3[%c0_65, %c8, %c0_66, %c0_67] : memref<1x26x2x128xf32, #tpu.memory_space<vmem>>, vector<1x1x2x128xf32>
    %96 = vector.shape_cast %95 : vector<1x1x2x128xf32> to vector<2x128xf32>
    %c0_68 = arith.constant 0 : index
    %c8_69 = arith.constant 8 : index
    %c0_70 = arith.constant 0 : index
    %c0_71 = arith.constant 0 : index
    %97 = vector.load %arg4[%c0_68, %c8_69, %c0_70, %c0_71] : memref<1x26x2x128xf32, #tpu.memory_space<vmem>>, vector<1x1x2x128xf32>
    %98 = vector.shape_cast %97 : vector<1x1x2x128xf32> to vector<2x128xf32>
    %99 = arith.subf %96, %98 : vector<2x128xf32>
    %c0_72 = arith.constant 0 : index
    %c9 = arith.constant 9 : index
    %c0_73 = arith.constant 0 : index
    %c0_74 = arith.constant 0 : index
    %100 = vector.load %arg3[%c0_72, %c9, %c0_73, %c0_74] : memref<1x26x2x128xf32, #tpu.memory_space<vmem>>, vector<1x1x2x128xf32>
    %101 = vector.shape_cast %100 : vector<1x1x2x128xf32> to vector<2x128xf32>
    %c0_75 = arith.constant 0 : index
    %c9_76 = arith.constant 9 : index
    %c0_77 = arith.constant 0 : index
    %c0_78 = arith.constant 0 : index
    %102 = vector.load %arg4[%c0_75, %c9_76, %c0_77, %c0_78] : memref<1x26x2x128xf32, #tpu.memory_space<vmem>>, vector<1x1x2x128xf32>
    %103 = vector.shape_cast %102 : vector<1x1x2x128xf32> to vector<2x128xf32>
    %104 = arith.subf %101, %103 : vector<2x128xf32>
    %105 = arith.mulf %99, %99 : vector<2x128xf32>
    %106 = arith.addf %71, %105 : vector<2x128xf32>
    %107 = arith.mulf %104, %104 : vector<2x128xf32>
    %108 = arith.addf %106, %107 : vector<2x128xf32>
    %c0_79 = arith.constant 0 : index
    %c10 = arith.constant 10 : index
    %c0_80 = arith.constant 0 : index
    %c0_81 = arith.constant 0 : index
    %109 = vector.load %arg3[%c0_79, %c10, %c0_80, %c0_81] : memref<1x26x2x128xf32, #tpu.memory_space<vmem>>, vector<1x1x2x128xf32>
    %110 = vector.shape_cast %109 : vector<1x1x2x128xf32> to vector<2x128xf32>
    %c0_82 = arith.constant 0 : index
    %c11 = arith.constant 11 : index
    %c0_83 = arith.constant 0 : index
    %c0_84 = arith.constant 0 : index
    %111 = vector.load %arg3[%c0_82, %c11, %c0_83, %c0_84] : memref<1x26x2x128xf32, #tpu.memory_space<vmem>>, vector<1x1x2x128xf32>
    %112 = vector.shape_cast %111 : vector<1x1x2x128xf32> to vector<2x128xf32>
    %c0_85 = arith.constant 0 : index
    %c10_86 = arith.constant 10 : index
    %c0_87 = arith.constant 0 : index
    %c0_88 = arith.constant 0 : index
    %113 = vector.load %arg4[%c0_85, %c10_86, %c0_87, %c0_88] : memref<1x26x2x128xf32, #tpu.memory_space<vmem>>, vector<1x1x2x128xf32>
    %114 = vector.shape_cast %113 : vector<1x1x2x128xf32> to vector<2x128xf32>
    %c0_89 = arith.constant 0 : index
    %c11_90 = arith.constant 11 : index
    %c0_91 = arith.constant 0 : index
    %c0_92 = arith.constant 0 : index
    %115 = vector.load %arg4[%c0_89, %c11_90, %c0_91, %c0_92] : memref<1x26x2x128xf32, #tpu.memory_space<vmem>>, vector<1x1x2x128xf32>
    %116 = vector.shape_cast %115 : vector<1x1x2x128xf32> to vector<2x128xf32>
    %117 = arith.maximumf %110, %112 : vector<2x128xf32>
    %118 = arith.subf %110, %112 : vector<2x128xf32>
    %119 = math.absf %118 : vector<2x128xf32>
    %cst_93 = arith.constant 0.000000e+00 : f32
    %120 = vector.broadcast %cst_93 : f32 to vector<2x128xf32>
    %121 = arith.subf %120, %119 : vector<2x128xf32>
    %122 = math.exp %121 : vector<2x128xf32>
    %123 = math.log1p %122 : vector<2x128xf32>
    %124 = arith.addf %117, %123 : vector<2x128xf32>
    %125 = arith.addf %114, %116 : vector<2x128xf32>
    %126 = arith.mulf %125, %124 : vector<2x128xf32>
    %127 = arith.mulf %114, %110 : vector<2x128xf32>
    %128 = arith.mulf %116, %112 : vector<2x128xf32>
    %129 = arith.addf %127, %128 : vector<2x128xf32>
    %130 = arith.subf %126, %129 : vector<2x128xf32>
    %131 = arith.addf %94, %130 : vector<2x128xf32>
    %c0_94 = arith.constant 0 : index
    %c12 = arith.constant 12 : index
    %c0_95 = arith.constant 0 : index
    %c0_96 = arith.constant 0 : index
    %132 = vector.load %arg3[%c0_94, %c12, %c0_95, %c0_96] : memref<1x26x2x128xf32, #tpu.memory_space<vmem>>, vector<1x1x2x128xf32>
    %133 = vector.shape_cast %132 : vector<1x1x2x128xf32> to vector<2x128xf32>
    %c0_97 = arith.constant 0 : index
    %c12_98 = arith.constant 12 : index
    %c0_99 = arith.constant 0 : index
    %c0_100 = arith.constant 0 : index
    %134 = vector.load %arg4[%c0_97, %c12_98, %c0_99, %c0_100] : memref<1x26x2x128xf32, #tpu.memory_space<vmem>>, vector<1x1x2x128xf32>
    %135 = vector.shape_cast %134 : vector<1x1x2x128xf32> to vector<2x128xf32>
    %136 = arith.subf %133, %135 : vector<2x128xf32>
    %c0_101 = arith.constant 0 : index
    %c13 = arith.constant 13 : index
    %c0_102 = arith.constant 0 : index
    %c0_103 = arith.constant 0 : index
    %137 = vector.load %arg3[%c0_101, %c13, %c0_102, %c0_103] : memref<1x26x2x128xf32, #tpu.memory_space<vmem>>, vector<1x1x2x128xf32>
    %138 = vector.shape_cast %137 : vector<1x1x2x128xf32> to vector<2x128xf32>
    %c0_104 = arith.constant 0 : index
    %c13_105 = arith.constant 13 : index
    %c0_106 = arith.constant 0 : index
    %c0_107 = arith.constant 0 : index
    %139 = vector.load %arg4[%c0_104, %c13_105, %c0_106, %c0_107] : memref<1x26x2x128xf32, #tpu.memory_space<vmem>>, vector<1x1x2x128xf32>
    %140 = vector.shape_cast %139 : vector<1x1x2x128xf32> to vector<2x128xf32>
    %141 = arith.subf %138, %140 : vector<2x128xf32>
    %142 = arith.mulf %136, %136 : vector<2x128xf32>
    %143 = arith.addf %108, %142 : vector<2x128xf32>
    %144 = arith.mulf %141, %141 : vector<2x128xf32>
    %145 = arith.addf %143, %144 : vector<2x128xf32>
    %c0_108 = arith.constant 0 : index
    %c14 = arith.constant 14 : index
    %c0_109 = arith.constant 0 : index
    %c0_110 = arith.constant 0 : index
    %146 = vector.load %arg3[%c0_108, %c14, %c0_109, %c0_110] : memref<1x26x2x128xf32, #tpu.memory_space<vmem>>, vector<1x1x2x128xf32>
    %147 = vector.shape_cast %146 : vector<1x1x2x128xf32> to vector<2x128xf32>
    %c0_111 = arith.constant 0 : index
    %c15 = arith.constant 15 : index
    %c0_112 = arith.constant 0 : index
    %c0_113 = arith.constant 0 : index
    %148 = vector.load %arg3[%c0_111, %c15, %c0_112, %c0_113] : memref<1x26x2x128xf32, #tpu.memory_space<vmem>>, vector<1x1x2x128xf32>
    %149 = vector.shape_cast %148 : vector<1x1x2x128xf32> to vector<2x128xf32>
    %c0_114 = arith.constant 0 : index
    %c14_115 = arith.constant 14 : index
    %c0_116 = arith.constant 0 : index
    %c0_117 = arith.constant 0 : index
    %150 = vector.load %arg4[%c0_114, %c14_115, %c0_116, %c0_117] : memref<1x26x2x128xf32, #tpu.memory_space<vmem>>, vector<1x1x2x128xf32>
    %151 = vector.shape_cast %150 : vector<1x1x2x128xf32> to vector<2x128xf32>
    %c0_118 = arith.constant 0 : index
    %c15_119 = arith.constant 15 : index
    %c0_120 = arith.constant 0 : index
    %c0_121 = arith.constant 0 : index
    %152 = vector.load %arg4[%c0_118, %c15_119, %c0_120, %c0_121] : memref<1x26x2x128xf32, #tpu.memory_space<vmem>>, vector<1x1x2x128xf32>
    %153 = vector.shape_cast %152 : vector<1x1x2x128xf32> to vector<2x128xf32>
    %154 = arith.maximumf %147, %149 : vector<2x128xf32>
    %155 = arith.subf %147, %149 : vector<2x128xf32>
    %156 = math.absf %155 : vector<2x128xf32>
    %cst_122 = arith.constant 0.000000e+00 : f32
    %157 = vector.broadcast %cst_122 : f32 to vector<2x128xf32>
    %158 = arith.subf %157, %156 : vector<2x128xf32>
    %159 = math.exp %158 : vector<2x128xf32>
    %160 = math.log1p %159 : vector<2x128xf32>
    %161 = arith.addf %154, %160 : vector<2x128xf32>
    %162 = arith.addf %151, %153 : vector<2x128xf32>
    %163 = arith.mulf %162, %161 : vector<2x128xf32>
    %164 = arith.mulf %151, %147 : vector<2x128xf32>
    %165 = arith.mulf %153, %149 : vector<2x128xf32>
    %166 = arith.addf %164, %165 : vector<2x128xf32>
    %167 = arith.subf %163, %166 : vector<2x128xf32>
    %168 = arith.addf %131, %167 : vector<2x128xf32>
    %c0_123 = arith.constant 0 : index
    %c16 = arith.constant 16 : index
    %c0_124 = arith.constant 0 : index
    %c0_125 = arith.constant 0 : index
    %169 = vector.load %arg3[%c0_123, %c16, %c0_124, %c0_125] : memref<1x26x2x128xf32, #tpu.memory_space<vmem>>, vector<1x1x2x128xf32>
    %170 = vector.shape_cast %169 : vector<1x1x2x128xf32> to vector<2x128xf32>
    %c0_126 = arith.constant 0 : index
    %c16_127 = arith.constant 16 : index
    %c0_128 = arith.constant 0 : index
    %c0_129 = arith.constant 0 : index
    %171 = vector.load %arg4[%c0_126, %c16_127, %c0_128, %c0_129] : memref<1x26x2x128xf32, #tpu.memory_space<vmem>>, vector<1x1x2x128xf32>
    %172 = vector.shape_cast %171 : vector<1x1x2x128xf32> to vector<2x128xf32>
    %173 = arith.subf %170, %172 : vector<2x128xf32>
    %c0_130 = arith.constant 0 : index
    %c17 = arith.constant 17 : index
    %c0_131 = arith.constant 0 : index
    %c0_132 = arith.constant 0 : index
    %174 = vector.load %arg3[%c0_130, %c17, %c0_131, %c0_132] : memref<1x26x2x128xf32, #tpu.memory_space<vmem>>, vector<1x1x2x128xf32>
    %175 = vector.shape_cast %174 : vector<1x1x2x128xf32> to vector<2x128xf32>
    %c0_133 = arith.constant 0 : index
    %c17_134 = arith.constant 17 : index
    %c0_135 = arith.constant 0 : index
    %c0_136 = arith.constant 0 : index
    %176 = vector.load %arg4[%c0_133, %c17_134, %c0_135, %c0_136] : memref<1x26x2x128xf32, #tpu.memory_space<vmem>>, vector<1x1x2x128xf32>
    %177 = vector.shape_cast %176 : vector<1x1x2x128xf32> to vector<2x128xf32>
    %178 = arith.subf %175, %177 : vector<2x128xf32>
    %179 = arith.mulf %173, %173 : vector<2x128xf32>
    %180 = arith.addf %145, %179 : vector<2x128xf32>
    %181 = arith.mulf %178, %178 : vector<2x128xf32>
    %182 = arith.addf %180, %181 : vector<2x128xf32>
    %c0_137 = arith.constant 0 : index
    %c18 = arith.constant 18 : index
    %c0_138 = arith.constant 0 : index
    %c0_139 = arith.constant 0 : index
    %183 = vector.load %arg3[%c0_137, %c18, %c0_138, %c0_139] : memref<1x26x2x128xf32, #tpu.memory_space<vmem>>, vector<1x1x2x128xf32>
    %184 = vector.shape_cast %183 : vector<1x1x2x128xf32> to vector<2x128xf32>
    %c0_140 = arith.constant 0 : index
    %c19 = arith.constant 19 : index
    %c0_141 = arith.constant 0 : index
    %c0_142 = arith.constant 0 : index
    %185 = vector.load %arg3[%c0_140, %c19, %c0_141, %c0_142] : memref<1x26x2x128xf32, #tpu.memory_space<vmem>>, vector<1x1x2x128xf32>
    %186 = vector.shape_cast %185 : vector<1x1x2x128xf32> to vector<2x128xf32>
    %c0_143 = arith.constant 0 : index
    %c18_144 = arith.constant 18 : index
    %c0_145 = arith.constant 0 : index
    %c0_146 = arith.constant 0 : index
    %187 = vector.load %arg4[%c0_143, %c18_144, %c0_145, %c0_146] : memref<1x26x2x128xf32, #tpu.memory_space<vmem>>, vector<1x1x2x128xf32>
    %188 = vector.shape_cast %187 : vector<1x1x2x128xf32> to vector<2x128xf32>
    %c0_147 = arith.constant 0 : index
    %c19_148 = arith.constant 19 : index
    %c0_149 = arith.constant 0 : index
    %c0_150 = arith.constant 0 : index
    %189 = vector.load %arg4[%c0_147, %c19_148, %c0_149, %c0_150] : memref<1x26x2x128xf32, #tpu.memory_space<vmem>>, vector<1x1x2x128xf32>
    %190 = vector.shape_cast %189 : vector<1x1x2x128xf32> to vector<2x128xf32>
    %191 = arith.maximumf %184, %186 : vector<2x128xf32>
    %192 = arith.subf %184, %186 : vector<2x128xf32>
    %193 = math.absf %192 : vector<2x128xf32>
    %cst_151 = arith.constant 0.000000e+00 : f32
    %194 = vector.broadcast %cst_151 : f32 to vector<2x128xf32>
    %195 = arith.subf %194, %193 : vector<2x128xf32>
    %196 = math.exp %195 : vector<2x128xf32>
    %197 = math.log1p %196 : vector<2x128xf32>
    %198 = arith.addf %191, %197 : vector<2x128xf32>
    %199 = arith.addf %188, %190 : vector<2x128xf32>
    %200 = arith.mulf %199, %198 : vector<2x128xf32>
    %201 = arith.mulf %188, %184 : vector<2x128xf32>
    %202 = arith.mulf %190, %186 : vector<2x128xf32>
    %203 = arith.addf %201, %202 : vector<2x128xf32>
    %204 = arith.subf %200, %203 : vector<2x128xf32>
    %205 = arith.addf %168, %204 : vector<2x128xf32>
    %c0_152 = arith.constant 0 : index
    %c20 = arith.constant 20 : index
    %c0_153 = arith.constant 0 : index
    %c0_154 = arith.constant 0 : index
    %206 = vector.load %arg3[%c0_152, %c20, %c0_153, %c0_154] : memref<1x26x2x128xf32, #tpu.memory_space<vmem>>, vector<1x1x2x128xf32>
    %207 = vector.shape_cast %206 : vector<1x1x2x128xf32> to vector<2x128xf32>
    %c0_155 = arith.constant 0 : index
    %c20_156 = arith.constant 20 : index
    %c0_157 = arith.constant 0 : index
    %c0_158 = arith.constant 0 : index
    %208 = vector.load %arg4[%c0_155, %c20_156, %c0_157, %c0_158] : memref<1x26x2x128xf32, #tpu.memory_space<vmem>>, vector<1x1x2x128xf32>
    %209 = vector.shape_cast %208 : vector<1x1x2x128xf32> to vector<2x128xf32>
    %210 = arith.subf %207, %209 : vector<2x128xf32>
    %c0_159 = arith.constant 0 : index
    %c21 = arith.constant 21 : index
    %c0_160 = arith.constant 0 : index
    %c0_161 = arith.constant 0 : index
    %211 = vector.load %arg3[%c0_159, %c21, %c0_160, %c0_161] : memref<1x26x2x128xf32, #tpu.memory_space<vmem>>, vector<1x1x2x128xf32>
    %212 = vector.shape_cast %211 : vector<1x1x2x128xf32> to vector<2x128xf32>
    %c0_162 = arith.constant 0 : index
    %c21_163 = arith.constant 21 : index
    %c0_164 = arith.constant 0 : index
    %c0_165 = arith.constant 0 : index
    %213 = vector.load %arg4[%c0_162, %c21_163, %c0_164, %c0_165] : memref<1x26x2x128xf32, #tpu.memory_space<vmem>>, vector<1x1x2x128xf32>
    %214 = vector.shape_cast %213 : vector<1x1x2x128xf32> to vector<2x128xf32>
    %215 = arith.subf %212, %214 : vector<2x128xf32>
    %216 = arith.mulf %210, %210 : vector<2x128xf32>
    %217 = arith.addf %182, %216 : vector<2x128xf32>
    %218 = arith.mulf %215, %215 : vector<2x128xf32>
    %219 = arith.addf %217, %218 : vector<2x128xf32>
    %c0_166 = arith.constant 0 : index
    %c22 = arith.constant 22 : index
    %c0_167 = arith.constant 0 : index
    %c0_168 = arith.constant 0 : index
    %220 = vector.load %arg3[%c0_166, %c22, %c0_167, %c0_168] : memref<1x26x2x128xf32, #tpu.memory_space<vmem>>, vector<1x1x2x128xf32>
    %221 = vector.shape_cast %220 : vector<1x1x2x128xf32> to vector<2x128xf32>
    %c0_169 = arith.constant 0 : index
    %c23 = arith.constant 23 : index
    %c0_170 = arith.constant 0 : index
    %c0_171 = arith.constant 0 : index
    %222 = vector.load %arg3[%c0_169, %c23, %c0_170, %c0_171] : memref<1x26x2x128xf32, #tpu.memory_space<vmem>>, vector<1x1x2x128xf32>
    %223 = vector.shape_cast %222 : vector<1x1x2x128xf32> to vector<2x128xf32>
    %c0_172 = arith.constant 0 : index
    %c22_173 = arith.constant 22 : index
    %c0_174 = arith.constant 0 : index
    %c0_175 = arith.constant 0 : index
    %224 = vector.load %arg4[%c0_172, %c22_173, %c0_174, %c0_175] : memref<1x26x2x128xf32, #tpu.memory_space<vmem>>, vector<1x1x2x128xf32>
    %225 = vector.shape_cast %224 : vector<1x1x2x128xf32> to vector<2x128xf32>
    %c0_176 = arith.constant 0 : index
    %c23_177 = arith.constant 23 : index
    %c0_178 = arith.constant 0 : index
    %c0_179 = arith.constant 0 : index
    %226 = vector.load %arg4[%c0_176, %c23_177, %c0_178, %c0_179] : memref<1x26x2x128xf32, #tpu.memory_space<vmem>>, vector<1x1x2x128xf32>
    %227 = vector.shape_cast %226 : vector<1x1x2x128xf32> to vector<2x128xf32>
    %228 = arith.maximumf %221, %223 : vector<2x128xf32>
    %229 = arith.subf %221, %223 : vector<2x128xf32>
    %230 = math.absf %229 : vector<2x128xf32>
    %cst_180 = arith.constant 0.000000e+00 : f32
    %231 = vector.broadcast %cst_180 : f32 to vector<2x128xf32>
    %232 = arith.subf %231, %230 : vector<2x128xf32>
    %233 = math.exp %232 : vector<2x128xf32>
    %234 = math.log1p %233 : vector<2x128xf32>
    %235 = arith.addf %228, %234 : vector<2x128xf32>
    %236 = arith.addf %225, %227 : vector<2x128xf32>
    %237 = arith.mulf %236, %235 : vector<2x128xf32>
    %238 = arith.mulf %225, %221 : vector<2x128xf32>
    %239 = arith.mulf %227, %223 : vector<2x128xf32>
    %240 = arith.addf %238, %239 : vector<2x128xf32>
    %241 = arith.subf %237, %240 : vector<2x128xf32>
    %242 = arith.addf %205, %241 : vector<2x128xf32>
    %c0_181 = arith.constant 0 : index
    %c24 = arith.constant 24 : index
    %c0_182 = arith.constant 0 : index
    %c0_183 = arith.constant 0 : index
    %243 = vector.load %arg3[%c0_181, %c24, %c0_182, %c0_183] : memref<1x26x2x128xf32, #tpu.memory_space<vmem>>, vector<1x1x2x128xf32>
    %244 = vector.shape_cast %243 : vector<1x1x2x128xf32> to vector<2x128xf32>
    %c0_184 = arith.constant 0 : index
    %c24_185 = arith.constant 24 : index
    %c0_186 = arith.constant 0 : index
    %c0_187 = arith.constant 0 : index
    %245 = vector.load %arg4[%c0_184, %c24_185, %c0_186, %c0_187] : memref<1x26x2x128xf32, #tpu.memory_space<vmem>>, vector<1x1x2x128xf32>
    %246 = vector.shape_cast %245 : vector<1x1x2x128xf32> to vector<2x128xf32>
    %247 = arith.subf %244, %246 : vector<2x128xf32>
    %c0_188 = arith.constant 0 : index
    %c25 = arith.constant 25 : index
    %c0_189 = arith.constant 0 : index
    %c0_190 = arith.constant 0 : index
    %248 = vector.load %arg3[%c0_188, %c25, %c0_189, %c0_190] : memref<1x26x2x128xf32, #tpu.memory_space<vmem>>, vector<1x1x2x128xf32>
    %249 = vector.shape_cast %248 : vector<1x1x2x128xf32> to vector<2x128xf32>
    %c0_191 = arith.constant 0 : index
    %c25_192 = arith.constant 25 : index
    %c0_193 = arith.constant 0 : index
    %c0_194 = arith.constant 0 : index
    %250 = vector.load %arg4[%c0_191, %c25_192, %c0_193, %c0_194] : memref<1x26x2x128xf32, #tpu.memory_space<vmem>>, vector<1x1x2x128xf32>
    %251 = vector.shape_cast %250 : vector<1x1x2x128xf32> to vector<2x128xf32>
    %252 = arith.subf %249, %251 : vector<2x128xf32>
    %253 = arith.mulf %247, %247 : vector<2x128xf32>
    %254 = arith.addf %219, %253 : vector<2x128xf32>
    %255 = arith.mulf %252, %252 : vector<2x128xf32>
    %256 = arith.addf %254, %255 : vector<2x128xf32>
    %257 = arith.mulf %12, %242 : vector<2x128xf32>
    %258 = arith.mulf %12, %256 : vector<2x128xf32>
    %c0_195 = arith.constant 0 : index
    %c0_196 = arith.constant 0 : index
    %c0_197 = arith.constant 0 : index
    %259 = vector.load %arg5[%c0_195, %c0_196, %c0_197] : memref<1x1x128xf32, #tpu.memory_space<vmem>>, vector<1x1x128xf32>
    %cst_198 = arith.constant dense<0.000000e+00> : vector<128xf32>
    %260 = vector.multi_reduction <add>, %32, %cst_198 [0] : vector<2x128xf32> to vector<128xf32>
    %261 = vector.shape_cast %260 : vector<128xf32> to vector<1x1x128xf32>
    %262 = arith.addf %259, %261 : vector<1x1x128xf32>
    %c0_199 = arith.constant 0 : index
    %c0_200 = arith.constant 0 : index
    %c0_201 = arith.constant 0 : index
    %263 = vector.load %arg5[%c0_199, %c0_200, %c0_201] : memref<1x1x128xf32, #tpu.memory_space<vmem>>, vector<1x1x128xf32>
    tpu.vector_store %arg5[%c0_199, %c0_200, %c0_201], %262 {strides = array<i32>} : memref<1x1x128xf32, #tpu.memory_space<vmem>>, vector<1x1x128xf32>,
    %c0_202 = arith.constant 0 : index
    %c0_203 = arith.constant 0 : index
    %c0_204 = arith.constant 0 : index
    %264 = vector.load %arg6[%c0_202, %c0_203, %c0_204] : memref<1x1x128xf32, #tpu.memory_space<vmem>>, vector<1x1x128xf32>
    %cst_205 = arith.constant dense<0.000000e+00> : vector<128xf32>
    %265 = vector.multi_reduction <add>, %257, %cst_205 [0] : vector<2x128xf32> to vector<128xf32>
    %266 = vector.shape_cast %265 : vector<128xf32> to vector<1x1x128xf32>
    %267 = arith.addf %264, %266 : vector<1x1x128xf32>
    %c0_206 = arith.constant 0 : index
    %c0_207 = arith.constant 0 : index
    %c0_208 = arith.constant 0 : index
    %268 = vector.load %arg6[%c0_206, %c0_207, %c0_208] : memref<1x1x128xf32, #tpu.memory_space<vmem>>, vector<1x1x128xf32>
    tpu.vector_store %arg6[%c0_206, %c0_207, %c0_208], %267 {strides = array<i32>} : memref<1x1x128xf32, #tpu.memory_space<vmem>>, vector<1x1x128xf32>,
    %c0_209 = arith.constant 0 : index
    %c0_210 = arith.constant 0 : index
    %c0_211 = arith.constant 0 : index
    %269 = vector.load %arg7[%c0_209, %c0_210, %c0_211] : memref<1x1x128xf32, #tpu.memory_space<vmem>>, vector<1x1x128xf32>
    %cst_212 = arith.constant dense<0.000000e+00> : vector<128xf32>
    %270 = vector.multi_reduction <add>, %258, %cst_212 [0] : vector<2x128xf32> to vector<128xf32>
    %271 = vector.shape_cast %270 : vector<128xf32> to vector<1x1x128xf32>
    %272 = arith.addf %269, %271 : vector<1x1x128xf32>
    %c0_213 = arith.constant 0 : index
    %c0_214 = arith.constant 0 : index
    %c0_215 = arith.constant 0 : index
    %273 = vector.load %arg7[%c0_213, %c0_214, %c0_215] : memref<1x1x128xf32, #tpu.memory_space<vmem>>, vector<1x1x128xf32>
    tpu.vector_store %arg7[%c0_213, %c0_214, %c0_215], %272 {strides = array<i32>} : memref<1x1x128xf32, #tpu.memory_space<vmem>>, vector<1x1x128xf32>,
    return
  }
  func.func @transform_0(%arg0: i32, %arg1: i32, %arg2: i32) -> (i32, i32, i32, i32) {
    %c1_i32 = arith.constant 1 : i32
    %0 = arith.muli %arg1, %c1_i32 : i32
    %1 = arith.addi %0, %arg2 : i32
    %c0_i32 = arith.constant 0 : i32
    %c0_i32_0 = arith.constant 0 : i32
    %c0_i32_1 = arith.constant 0 : i32
    return %arg0, %c0_i32, %1, %c0_i32_0 : i32, i32, i32, i32
  }
  func.func @transform_1(%arg0: i32, %arg1: i32, %arg2: i32) -> (i32, i32, i32, i32) {
    %c1_i32 = arith.constant 1 : i32
    %0 = arith.muli %arg1, %c1_i32 : i32
    %1 = arith.addi %0, %arg2 : i32
    %c0_i32 = arith.constant 0 : i32
    %c0_i32_0 = arith.constant 0 : i32
    %c0_i32_1 = arith.constant 0 : i32
    return %arg0, %c0_i32, %1, %c0_i32_0 : i32, i32, i32, i32
  }
  func.func @transform_2(%arg0: i32, %arg1: i32, %arg2: i32) -> (i32, i32, i32) {
    %c1_i32 = arith.constant 1 : i32
    %0 = arith.muli %arg0, %c1_i32 : i32
    %1 = arith.addi %0, %arg1 : i32
    %c0_i32 = arith.constant 0 : i32
    %c0_i32_0 = arith.constant 0 : i32
    %c0_i32_1 = arith.constant 0 : i32
    return %1, %c0_i32, %c0_i32_0 : i32, i32, i32
  }
  func.func @transform_3(%arg0: i32, %arg1: i32, %arg2: i32) -> (i32, i32, i32) {
    %c1_i32 = arith.constant 1 : i32
    %0 = arith.muli %arg0, %c1_i32 : i32
    %1 = arith.addi %0, %arg1 : i32
    %c0_i32 = arith.constant 0 : i32
    %c0_i32_0 = arith.constant 0 : i32
    %c0_i32_1 = arith.constant 0 : i32
    return %1, %c0_i32, %c0_i32_0 : i32, i32, i32
  }
  func.func @transform_4(%arg0: i32, %arg1: i32, %arg2: i32) -> (i32, i32, i32) {
    %c1_i32 = arith.constant 1 : i32
    %0 = arith.muli %arg0, %c1_i32 : i32
    %1 = arith.addi %0, %arg1 : i32
    %c0_i32 = arith.constant 0 : i32
    %c0_i32_0 = arith.constant 0 : i32
    %c0_i32_1 = arith.constant 0 : i32
    return %1, %c0_i32, %c0_i32_0 : i32, i32, i32
  }
}

</mosaic_0001>

<bundles_post_ra>
// kernel: supervised_loss.1
= control target key start
LH: loop header
LB: loop body
LE: loop exit
PB: predicated region body
PF: predicated region fallthrough
CT: control target
= control target key end

     0   :  { %s949_s15 = smov 0   ;;  %s951_s16 = smov 0   ;;  %s1238_s0 = inlined_call_operand.vmem [shape: f32[2,26,2,128], index: 0, kind: input, shape index: {}]   ;;  %s1239_s1 = inlined_call_operand.vmem [shape: f32[2,26,2,128], index: 1, kind: input, shape index: {}]   ;;  %s1240_s2 = inlined_call_operand.vmem [shape: f32[2,1,128], index: 2, kind: output, shape index: {0}]   ;;  %s1241_s3 = inlined_call_operand.vmem [shape: f32[2,1,128], index: 3, kind: output, shape index: {1}]   ;;  %s1242_s4 = inlined_call_operand.vmem [shape: f32[2,1,128], index: 4, kind: output, shape index: {2}]  }
   0x1   :  { %s953_s17 = smov 0  }
   0x2 LB: > { %s34_s18 = sadd.s32 1, %s917_s16  ;;  %p789_p0 = scmp.ge.s32.totalorder %s921_s17, 1  ;;  %s921_s17 = sphi %s953_s17, %s15_s17   ;;  %s917_s16 = sphi %s951_s16, %s1273_s16   ;;  %s913_s15 = sphi %s949_s15, %s1272_s15  }
   0x3   : > { %p36_p1 = scmp.ge.s32.totalorder %s34_s18, 2  ;;  %p220_p2 = scmp.lt.s32.totalorder %s921_s17, 3 }
   0x5   : > { %s1275_s18 = smov (%p36_p1, %s34_s18), 0  ;;  %p221_p3 = pnand %p789_p0, %p220_p2 }
   0x7   : > { %224 = sbr.rel (%p221_p3) target bundleno = 102 (0x66), region = 28 }
   0xe   : > { %p267_p4 = scmp.lt.s32.totalorder %s913_s15, 1  ;;  %v923_v0 = vmov 0.0   ;;  %vm613_vm3 = vcmask 1041408  }
  0x10   : > { %s1277_s15 = smov (!%p267_p4, %s913_s15), 1 }
  0x11   : > { %s845_s19 = smul.u32 52, %s1277_s15  ;;  %s970_s22 = scalar_lea.vmem %s1240_s2, %s1277_s15 }
  0x12   : > { %305 = vst [vmem:[%s970_s22] sm:$0x1] %v923_v0  ;;  %s976_s25 = scalar_lea.vmem %s1241_s3, %s1277_s15  ;;  %s981_s28 = scalar_lea.vmem %s1242_s4, %s1277_s15 }
  0x13   : > { %s986_s5 = scalar_lea.vmem %s1238_s0, %s845_s19  ;;  %s991_s8 = scalar_lea.vmem %s1239_s1, %s845_s19  ;;  %306 = vst [vmem:[%s976_s25] sm:$0x1] %v923_v0  ;;  %307 = vst [vmem:[%s981_s28] sm:$0x1] %v923_v0 }
  0x14   : > { %v308_v1 = vld [vmem:[%s991_s8] sm:$0x3]  ;;  %v1000_v3 = vld [vmem:[%s986_s5 + $0x2] sm:$0x3]  ;;  %v1005_v6 = vld [vmem:[%s986_s5 + $0x4] sm:$0x3] }
  0x15   : > { %v997_v2 = vld [vmem:[%s986_s5] sm:$0x3]  ;;  %v792_v5 = vadd.f32 -0.01, %v308_v1  ;;  %v794_v7 = vld [vmem:[%s991_s8 + $0x2] sm:$0x3] }
  0x16   : > { %v319_v4 = vsub.f32 %v997_v2, %v1000_v3  ;;  %v1009_v8 = vld [vmem:[%s986_s5 + $0x6] sm:$0x3]  ;;  %v1014_v11 = vld [vmem:[%s986_s5 + $0xc] sm:$0x3]  ;;  %v1017_v13 = vld [vmem:[%s986_s5 + $0xe] sm:$0x3]  ;;  %v336_v15 = vmul.f32 %v997_v2, %v308_v1  ;;  %v337_v16 = vmul.f32 %v794_v7, %v1000_v3  ;;  %v1034_v26 = vadd.f32 %v794_v7, %v308_v1 }
  0x17   : > { %v349_v10 = vsub.f32 %v1005_v6, %v1009_v8  ;;  %v310_v12 = vmax.f32 %v792_v5, 0.0  ;;  %v797_v17 = vld [vmem:[%s991_s8 + $0x4] sm:$0x3]  ;;  %v798_v18 = vld [vmem:[%s991_s8 + $0x6] sm:$0x3]  ;;  %v394_v19 = vsub.f32 %v1014_v11, %v1017_v13 }
  0x18   : > { %v320_v9 = vand.u32 2147483647, %v319_v4  ;;  %v805_v21 = vld [vmem:[%s991_s8 + $0xc] sm:$0x3]  ;;  %v1027_v22 = vld [vmem:[%s986_s5 + $0x14] sm:$0x3]  ;;  %v1042_v34 = vadd.f32 %v337_v16, %v336_v15  ;;  %v1044_v35 = vadd.f32 %v798_v18, %v797_v17  ;;  %v366_v40 = vmul.f32 %v797_v17, %v1005_v6 }
  0x19   : > { %v350_v20 = vand.u32 2147483647, %v349_v10  ;;  %v1030_v23 = vld [vmem:[%s986_s5 + $0x16] sm:$0x3]  ;;  %v806_v27 = vld [vmem:[%s991_s8 + $0xe] sm:$0x3]  ;;  %v367_v41 = vmul.f32 %v798_v18, %v1009_v8  ;;  %v411_v45 = vmul.f32 %v805_v21, %v1014_v11 }
  0x1a   : > { %v321_v14 = vsub.f32 0.0, %v320_v9  ;;  %v395_v28 = vand.u32 2147483647, %v394_v19  ;;  %v311_v29 = vmin.f32 %v310_v12, 0.99  ;;  %v439_v33 = vsub.f32 %v1027_v22, %v1030_v23 }
  0x1b   : > { %v351_v31 = vsub.f32 0.0, %v350_v20  ;;  %v813_v32 = vld [vmem:[%s991_s8 + $0x14] sm:$0x3]  ;;  %v1047_v37 = vld [vmem:[%s986_s5 + $0x1c] sm:$0x3]  ;;  %v412_v46 = vmul.f32 %v806_v27, %v1017_v13  ;;  %v1075_v58 = vadd.f32 %v367_v41, %v366_v40  ;;  %v1077_v59 = vadd.f32 %v806_v27, %v805_v21 }
  0x1c   : > { %v322_v25 = vmul.f32 1.442695, %v321_v14  ;;  %v396_v36 = vsub.f32 0.0, %v395_v28  ;;  %v1050_v38 = vld [vmem:[%s986_s5 + $0x1e] sm:$0x3]  ;;  %v456_v53 = vmul.f32 %v813_v32, %v1027_v22 }
  0x1d   : > { %v352_v39 = vmul.f32 1.442695, %v351_v31  ;;  %v814_v42 = vld [vmem:[%s991_s8 + $0x16] sm:$0x3]  ;;  %v440_v43 = vand.u32 2147483647, %v439_v33  ;;  %v484_v47 = vsub.f32 %v1047_v37, %v1050_v38  ;;  %v1085_v0 = vadd.f32 %v412_v46, %v411_v45 }
  0x1e   : > { %871 = vpow2.f32 %v322_v25  ;;  %v397_v44 = vmul.f32 1.442695, %v396_v36  ;;  %v1060_v48 = vld [vmem:[%s986_s5 + $0x24] sm:$0x3]  ;;  %v1062_v49 = vadd.f32 0.01, %v311_v29  ;;  %v457_v54 = vmul.f32 %v814_v42, %v1030_v23 }
  0x1f   : > { %1246 = vst [vmem:[#allocation2_spill] sm:$0xff] %v1060_v48  ;;  %873 = vpow2.f32 %v352_v39  ;;  %v441_v51 = vsub.f32 0.0, %v440_v43  ;;  %v1067_v52 = vld [vmem:[%s986_s5 + $0x26] sm:$0x3]  ;;  %v821_v55 = vld [vmem:[%s991_s8 + $0x1c] sm:$0x3]  ;;  %v1089_v4 = vadd.f32 %v814_v42, %v813_v32 }
  0x20   : > { %1247 = vst [vmem:[#allocation3_spill] sm:$0xff] %v1062_v49  ;;  %1248 = vst [vmem:[#allocation4_spill] sm:$0xff] %v1067_v52  ;;  %875 = vpow2.f32 %v397_v44  ;;  %v485_v56 = vand.u32 2147483647, %v484_v47  ;;  %v1073_v57 = vld [vmem:[%s986_s5 + $0x2c] sm:$0x3]  ;;  %v529_v62 = vsub.f32 %v1060_v48, %v1067_v52  ;;  %v1099_v17 = vadd.f32 %v457_v54, %v456_v53 }
  0x21   : > { %v442_v60 = vmul.f32 1.442695, %v441_v51  ;;  %v822_v61 = vld [vmem:[%s991_s8 + $0x1e] sm:$0x3]  ;;  %v1083_v63 = vld [vmem:[%s986_s5 + $0x2e] sm:$0x3]  ;;  %v501_v19 = vmul.f32 %v821_v55, %v1047_v37 }
  0x22   : > { %v486_v5 = vsub.f32 0.0, %v485_v56  ;;  %v829_v7 = vld [vmem:[%s991_s8 + $0x24] sm:$0x3]  ;;  %v830_v9 = vld [vmem:[%s991_s8 + $0x26] sm:$0x3]  ;;  %v574_v14 = vsub.f32 %v1073_v57, %v1083_v63  ;;  %v502_v20 = vmul.f32 %v822_v61, %v1050_v38  ;;  %v1105_v33 = vadd.f32 %v822_v61, %v821_v55 }
  0x23   : > { %877 = vpow2.f32 %v442_v60  ;;  %v530_v12 = vand.u32 2147483647, %v529_v62  ;;  %v799_v15 = vld [vmem:[%s986_s5 + $0x8] sm:$0x3]  ;;  %v801_v21 = vld [vmem:[%s986_s5 + $0xa] sm:$0x3]  ;;  %v1109_v39 = vadd.f32 %v830_v9, %v829_v7  ;;  %v1114_v45 = vmul.f32 %v829_v7, %v1060_v48 }
  0x24   : > { %v800_v16 = vld [vmem:[%s991_s8 + $0x8] sm:$0x3]  ;;  %v487_v18 = vmul.f32 1.442695, %v486_v5  ;;  %v802_v25 = vld [vmem:[%s991_s8 + $0xa] sm:$0x3]  ;;  %v1117_v51 = vadd.f32 %v502_v20, %v501_v19 }
  0x25   : > { %v531_v27 = vsub.f32 0.0, %v530_v12  ;;  %v575_v28 = vand.u32 2147483647, %v574_v14  ;;  %v375_v29 = vsub.f32 %v799_v15, %v800_v16  ;;  %v380_v31 = vsub.f32 %v801_v21, %v802_v25  ;;  %1249 = vst [vmem:[#allocation5_spill] sm:$0xff] %v1109_v39  ;;  %v807_v40 = vld [vmem:[%s986_s5 + $0x10] sm:$0x3] }
  0x26   : > { %879 = vpow2.f32 %v487_v18  ;;  %v808_v41 = vld [vmem:[%s991_s8 + $0x10] sm:$0x3]  ;;  %v809_v46 = vld [vmem:[%s986_s5 + $0x12] sm:$0x3]  ;;  %v815_v20 = vld [vmem:[%s986_s5 + $0x18] sm:$0x3]  ;;  %v1122_v25 = vmul.f32 %v830_v9, %v1067_v52 }
  0x27   : > { %v532_v44 = vmul.f32 1.442695, %v531_v27  ;;  %v576_v53 = vsub.f32 0.0, %v575_v28  ;;  %v381_v54 = vmul.f32 %v375_v29, %v375_v29  ;;  %v810_v55 = vld [vmem:[%s991_s8 + $0x12] sm:$0x3]  ;;  %v383_v61 = vmul.f32 %v380_v31, %v380_v31 }
  0x28   : > { %v872_v32 = vpop.eup %871  ;;  %v420_v62 = vsub.f32 %v807_v40, %v808_v41  ;;  %v425_v19 = vsub.f32 %v809_v46, %v810_v55  ;;  %v816_v28 = vld [vmem:[%s991_s8 + $0x18] sm:$0x3]  ;;  %v825_v36 = vld [vmem:[%s986_s5 + $0x22] sm:$0x3]  ;;  %v840_v55 = vld [vmem:[%s991_s8 + $0x30] sm:$0x3] }
  0x29   : > { %v324_v42 = vadd.f32 1.0, %v872_v32  ;;  %v327_v43 = vmul.f32 -0.5, %v872_v32  ;;  %v330_v47 = vand.u32 2147483647, %v872_v32  ;;  %v874_v56 = vpop.eup %873  ;;  %v577_v27 = vmul.f32 1.442695, %v576_v53 }
  0x2a   : > { %v876_v5 = vpop.eup %875  ;;  %v354_v12 = vadd.f32 1.0, %v874_v56  ;;  %v357_v14 = vmul.f32 -0.5, %v874_v56  ;;  %v360_v15 = vand.u32 2147483647, %v874_v56  ;;  %v384_v41 = vadd.f32 %v383_v61, %v381_v54  ;;  %v823_v54 = vld [vmem:[%s986_s5 + $0x20] sm:$0x3] }
  0x2b   : > { %881 = vlog2.f32 %v324_v42  ;;  %v328_v60 = vadd.f32 1.0, %v327_v43  ;;  %v399_v7 = vadd.f32 1.0, %v876_v5  ;;  %v402_v16 = vmul.f32 -0.5, %v876_v5  ;;  %v817_v42 = vld [vmem:[%s986_s5 + $0x1a] sm:$0x3] }
  0x2c   : > { %883 = vpow2.f32 %v532_v44  ;;  %v405_v18 = vand.u32 2147483647, %v876_v5  ;;  %v358_v21 = vadd.f32 1.0, %v357_v14  ;;  %vm1125_vm0 = vcmp.lt.f32.partialorder %v330_v47, 0.0004427343 }
  0x2d   : > { %885 = vlog2.f32 %v354_v12  ;;  %v878_v29 = vpop.eup %877  ;;  %v329_v31 = vmul.f32 %v872_v32, %v328_v60  ;;  %v818_v43 = vld [vmem:[%s991_s8 + $0x1a] sm:$0x3]  ;;  %vm1131_vm1 = vcmp.lt.f32.partialorder %v360_v15, 0.0004427343  ;;  %v403_v9 = vadd.f32 1.0, %v402_v16 }
  0x2e   : > { %887 = vlog2.f32 %v399_v7  ;;  %v444_v46 = vadd.f32 1.0, %v878_v29  ;;  %v447_v53 = vmul.f32 -0.5, %v878_v29  ;;  %vm1135_vm2 = vcmp.lt.f32.partialorder %v405_v18, 0.0004427343  ;;  %v824_v61 = vld [vmem:[%s991_s8 + $0x20] sm:$0x3] }
  0x2f   : > { %v450_v32 = vand.u32 2147483647, %v878_v29  ;;  %889 = vpow2.f32 %v577_v27  ;;  %v426_v47 = vmul.f32 %v420_v62, %v420_v62  ;;  %v428_v60 = vmul.f32 %v425_v19, %v425_v19  ;;  %v826_v50 = vld [vmem:[%s991_s8 + $0x22] sm:$0x3] }
  0x30   : > { %v880_v12 = vpop.eup %879  ;;  %v359_v14 = vmul.f32 %v874_v56, %v358_v21  ;;  %891 = vlog2.f32 %v444_v46  ;;  %v448_v15 = vadd.f32 1.0, %v447_v53  ;;  %v465_v7 = vsub.f32 %v815_v20, %v816_v28 }
  0x31   : > { %v489_v16 = vadd.f32 1.0, %v880_v12  ;;  %v492_v10 = vmul.f32 -0.5, %v880_v12  ;;  %v495_v1 = vand.u32 2147483647, %v880_v12  ;;  %v427_v18 = vadd.f32 %v426_v47, %v384_v41  ;;  %v831_v47 = vld [vmem:[%s986_s5 + $0x28] sm:$0x3] }
  0x32   : > { %v404_v30 = vmul.f32 %v876_v5, %v403_v9  ;;  %v470_v27 = vsub.f32 %v817_v42, %v818_v43  ;;  %v471_v62 = vmul.f32 %v465_v7, %v465_v7  ;;  %v510_v19 = vsub.f32 %v823_v54, %v824_v61  ;;  %v832_v5 = vld [vmem:[%s991_s8 + $0x28] sm:$0x3]  ;;  %v833_v7 = vld [vmem:[%s986_s5 + $0x2a] sm:$0x3] }
  0x33   : > { %vm1143_vm4 = vcmp.lt.f32.partialorder %v450_v32, 0.0004427343  ;;  %893 = vlog2.f32 %v489_v16  ;;  %v493_v56 = vadd.f32 1.0, %v492_v10  ;;  %v429_v20 = vadd.f32 %v428_v60, %v427_v18 }
  0x34   : > { %v449_v41 = vmul.f32 %v878_v29, %v448_v15  ;;  %v473_v46 = vmul.f32 %v470_v27, %v470_v27  ;;  %v515_v53 = vsub.f32 %v825_v36, %v826_v50  ;;  %vm1149_vm5 = vcmp.lt.f32.partialorder %v495_v1, 0.0004427343  ;;  %v834_v29 = vld [vmem:[%s991_s8 + $0x2a] sm:$0x3] }
  0x35   : > { %v882_v24 = vpop.eup %881  ;;  %v494_v60 = vmul.f32 %v880_v12, %v493_v56  ;;  %v472_v61 = vadd.f32 %v471_v62, %v429_v20  ;;  %v1260_v50 = vmax.f32 %v997_v2, %v1000_v3  ;;  %v555_v52 = vsub.f32 %v831_v47, %v832_v5 }
  0x36   : > { %v884_v21 = vpop.eup %883  ;;  %v326_v28 = vmul.f32 0.6931472, %v882_v24  ;;  %v516_v24 = vmul.f32 %v510_v19, %v510_v19  ;;  %v518_v39 = vmul.f32 %v515_v53, %v515_v53  ;;  %v560_v2 = vsub.f32 %v833_v7, %v834_v29 }
  0x37   : > { %v534_v43 = vadd.f32 1.0, %v884_v21  ;;  %v537_v9 = vmul.f32 -0.5, %v884_v21  ;;  %v540_v32 = vand.u32 2147483647, %v884_v21  ;;  %v886_v54 = vpop.eup %885  ;;  %v474_v27 = vadd.f32 %v473_v46, %v472_v61 }
  0x38   : > { %v332_v10 = vsel %vm1125_vm0, %v329_v31, %v326_v28  ;;  %v888_v15 = vpop.eup %887  ;;  %v356_v36 = vmul.f32 0.6931472, %v886_v54  ;;  %v1263_v62 = vmax.f32 %v1005_v6, %v1009_v8  ;;  %v561_v8 = vmul.f32 %v555_v52, %v555_v52 }
  0x39   : > { %v333_v1 = vadd.f32 %v332_v10, %v1260_v50  ;;  %895 = vlog2.f32 %v534_v43  ;;  %v538_v16 = vadd.f32 1.0, %v537_v9  ;;  %v401_v18 = vmul.f32 0.6931472, %v888_v15  ;;  %v1160_v48 = vpop.eup %889  ;;  %v841_v43 = vld [vmem:[%s986_s5 + $0x32] sm:$0x3] }
  0x3a   : > { %v362_v40 = vsel %vm1131_vm1, %v359_v14, %v356_v36  ;;  %vm1165_vm6 = vcmp.lt.f32.partialorder %v540_v32, 0.0004427343  ;;  %v892_v3 = vpop.eup %891  ;;  %v1264_v14 = vmax.f32 %v1014_v11, %v1017_v13  ;;  %v582_v53 = vmul.f32 -0.5, %v1160_v48  ;;  %v842_v10 = vld [vmem:[%s991_s8 + $0x32] sm:$0x3] }
  0x3b   : > { %v335_v31 = vmul.f32 %v1034_v26, %v333_v1  ;;  %v363_v19 = vadd.f32 %v362_v40, %v1263_v62  ;;  %v407_v56 = vsel %vm1135_vm2, %v404_v30, %v401_v18  ;;  %v539_v20 = vmul.f32 %v884_v21, %v538_v16  ;;  %v839_v30 = vld [vmem:[%s986_s5 + $0x30] sm:$0x3]  ;;  %v1267_v62 = vld [vmem:[#allocation2_spill] sm:$0xff] }
  0x3c   : > { %v579_v26 = vadd.f32 1.0, %v1160_v48  ;;  %v408_v28 = vadd.f32 %v407_v56, %v1264_v14  ;;  %v446_v46 = vmul.f32 0.6931472, %v892_v3  ;;  %v517_v6 = vadd.f32 %v516_v24, %v474_v27 }
  0x3d   : > { %v339_v44 = vsub.f32 %v335_v31, %v1042_v34  ;;  %v365_v47 = vmul.f32 %v1044_v35, %v363_v19  ;;  %v894_v21 = vpop.eup %893  ;;  %v585_v13 = vand.u32 2147483647, %v1160_v48  ;;  %v1265_v32 = vmax.f32 %v1027_v22, %v1030_v23  ;;  %v838_v31 = vld [vmem:[%s991_s8 + $0x2e] sm:$0x3] }
  0x3e   : > { %897 = vlog2.f32 %v579_v26  ;;  %v410_v34 = vmul.f32 %v1077_v59, %v408_v28  ;;  %v452_v11 = vsel %vm1143_vm4, %v449_v41, %v446_v46  ;;  %v491_v54 = vmul.f32 0.6931472, %v894_v21 }
  0x3f   : > { %v614_v5 = vsel %vm613_vm3, %v339_v44, 0.0  ;;  %v369_v35 = vsub.f32 %v365_v47, %v1075_v58  ;;  %v453_v52 = vadd.f32 %v452_v11, %v1265_v32  ;;  %v583_v24 = vadd.f32 1.0, %v582_v53  ;;  %v1270_v53 = vld [vmem:[#allocation5_spill] sm:$0xff] }
  0x40   : > { %v615_v9 = vrot.slane %v614_v5, 4  ;;  %v414_v61 = vsub.f32 %v410_v34, %v1085_v0  ;;  %v519_v7 = vadd.f32 %v518_v39, %v517_v6  ;;  %v563_v59 = vmul.f32 %v560_v2, %v560_v2 }
  0x41   : > { %v455_v41 = vmul.f32 %v1089_v4, %v453_v52  ;;  %v497_v29 = vsel %vm1149_vm5, %v494_v60, %v491_v54  ;;  %v600_v58 = vsub.f32 %v839_v30, %v840_v55  ;;  %v1266_v22 = vmax.f32 %v1047_v37, %v1050_v38  ;;  %v837_v4 = vld [vmem:[%s991_s8 + $0x2c] sm:$0x3] }
  0x42   : > { %v616_v49 = vadd.f32 %v615_v9, %v614_v5  ;;  %v415_v50 = vadd.f32 %v414_v61, %v369_v35  ;;  %v562_v1 = vadd.f32 %v561_v8, %v519_v7  ;;  %v605_v0 = vsub.f32 %v841_v43, %v842_v10 }
  0x43   : > { %v896_v15 = vpop.eup %895  ;;  %v498_v23 = vadd.f32 %v497_v29, %v1266_v22  ;;  %v459_v39 = vsub.f32 %v455_v41, %v1099_v17  ;;  %v606_v18 = vmul.f32 %v600_v58, %v600_v58  ;;  %v573_v42 = vmax.f32 %v1073_v57, %v1083_v63  ;;  %v623_v22 = vld [vmem:[%s976_s25] sm:$0x1] }
  0x44   : > { %v617_v36 = vrot.slane %v616_v49, 2  ;;  %v536_v16 = vmul.f32 0.6931472, %v896_v15  ;;  %v564_v60 = vadd.f32 %v563_v59, %v562_v1  ;;  %v608_v40 = vmul.f32 %v605_v0, %v605_v0  ;;  %v633_v59 = vld [vmem:[%s981_s28] sm:$0x1] }
  0x45   : > { %v500_v27 = vmul.f32 %v1105_v33, %v498_v23  ;;  %v460_v37 = vadd.f32 %v459_v39, %v415_v50  ;;  %v548_v17 = vadd.f32 %v1122_v25, %v1114_v45  ;;  %v1268_v33 = vld [vmem:[#allocation4_spill] sm:$0xff]  ;;  %v584_v26 = vmul.f32 %v1160_v48, %v583_v24  ;;  %v1271_v48 = vld [vmem:[#allocation3_spill] sm:$0xff] }
  0x46   : > { %v618_v2 = vadd.f32 %v617_v36, %v616_v49  ;;  %v542_v38 = vsel %vm1165_vm6, %v539_v20, %v536_v16  ;;  %v1269_v19 = vmax.f32 %v1267_v62, %v1268_v33  ;;  %v607_v44 = vadd.f32 %v606_v18, %v564_v60  ;;  %v612_v20 = vld [vmem:[%s970_s22] sm:$0x1] }
  0x47   : > { %v504_v3 = vsub.f32 %v500_v27, %v1117_v51  ;;  %vm586_vm7 = vcmp.lt.f32.partialorder %v585_v13, 0.0004427343  ;;  %v591_v46 = vmul.f32 %v837_v4, %v1073_v57  ;;  %v592_v12 = vmul.f32 %v838_v31, %v1083_v63 }
  0x48   : > { %v543_v56 = vadd.f32 %v542_v38, %v1269_v19  ;;  %v898_v14 = vpop.eup %897  ;;  %v619_v28 = vrot.slane %v618_v2, 1  ;;  %v609_v51 = vadd.f32 %v608_v40, %v607_v44  ;;  %v589_v8 = vadd.f32 %v838_v31, %v837_v4 }
  0x49   : > { %v581_v25 = vmul.f32 0.6931472, %v898_v14  ;;  %v505_v6 = vadd.f32 %v504_v3, %v460_v37  ;;  %v593_v11 = vadd.f32 %v592_v12, %v591_v46 }
  0x4a   : > { %v545_v45 = vmul.f32 %v1270_v53, %v543_v56  ;;  %v620_v47 = vadd.f32 %v619_v28, %v618_v2  ;;  %v611_v21 = vmul.f32 %v609_v51, %v1271_v48 }
  0x4b   : > { %v587_v55 = vsel %vm586_vm7, %v584_v26, %v581_v25 }
  0x4c   : > { %v549_v30 = vsub.f32 %v545_v45, %v548_v17  ;;  %v621_v5 = vadd.f32 %v620_v47, %v612_v20  ;;  %v588_v34 = vadd.f32 %v587_v55, %v573_v42  ;;  %v634_v57 = vsel %vm613_vm3, %v611_v21, 0.0 }
  0x4d   : > { %v635_v43 = vrot.slane %v634_v57, 4 }
  0x4e   : > { %622 = vst [vmem:[%s970_s22] sm:$0x1] %v621_v5  ;;  %v550_v63 = vadd.f32 %v549_v30, %v505_v6  ;;  %v590_v13 = vmul.f32 %v589_v8, %v588_v34 }
  0x4f   : > { %v636_v35 = vadd.f32 %v635_v43, %v634_v57 }
  0x50   : > { %v594_v9 = vsub.f32 %v590_v13, %v593_v11 }
  0x51   : > { %v637_v52 = vrot.slane %v636_v35, 2 }
  0x52   : > { %v595_v32 = vadd.f32 %v594_v9, %v550_v63 }
  0x53   : > { %v638_v10 = vadd.f32 %v637_v52, %v636_v35 }
  0x54   : > { %v610_v54 = vmul.f32 %v595_v32, %v1271_v48 }
  0x55   : > { %v639_v24 = vrot.slane %v638_v10, 1 }
  0x56   : > { %v624_v61 = vsel %vm613_vm3, %v610_v54, 0.0 }
  0x57   : > { %v625_v7 = vrot.slane %v624_v61, 4  ;;  %v640_v49 = vadd.f32 %v639_v24, %v638_v10 }
  0x59   : > { %v626_v41 = vadd.f32 %v625_v7, %v624_v61  ;;  %v641_v29 = vadd.f32 %v640_v49, %v633_v59 }
  0x5b   : > { %v627_v58 = vrot.slane %v626_v41, 2  ;;  %642 = vst [vmem:[%s981_s28] sm:$0x1] %v641_v29 }
  0x5d   : > { %v628_v15 = vadd.f32 %v627_v58, %v626_v41 }
  0x5f   : > { %v629_v50 = vrot.slane %v628_v15, 1 }
  0x61   : > { %v630_v23 = vadd.f32 %v629_v50, %v628_v15 }
  0x63   : > { %v631_v1 = vadd.f32 %v630_v23, %v623_v22 }
  0x65   : > { %632 = vst [vmem:[%s976_s25] sm:$0x1] %v631_v1 }
  0x66 PF: > { %s15_s17 = sadd.s32 1, %s921_s17   ;;  %s1272_s15 = smov %s917_s16 }
  0x67   : > { %p12_p5 = scmp.ge.s32.totalorder %s15_s17, 4   ;;  %s1273_s16 = smov %s1275_s18 }
  0x69   :  { %14 = sbr.rel (!%p12_p5) target bundleno = 2 (0x2), region = 139 }

</bundles_post_ra>
